<compile_context>
chip_gen: v5e
topology: v5e:2x2
jax: 0.10.0
libtpu: 0.0.40
codegen_flags: <defaults>
</compile_context>

<pallas_src>
import functools
import numpy as np
import jax
import jax.numpy as jnp
from jax.experimental import pallas as pl
from jax.experimental.pallas import tpu as pltpu

A_CUBIC = -0.75  # PyTorch's cubic convolution constant


def _cubic1(t, a=A_CUBIC):
    return ((a + 2.0) * t - (a + 3.0)) * t * t + 1.0


def _cubic2(t, a=A_CUBIC):
    return ((a * t - 5.0 * a) * t + 8.0 * a) * t - 4.0 * a


def _cubic_weights(t):
    # weights for taps at floor-1, floor, floor+1, floor+2 (PyTorch convention)
    return (_cubic2(t + 1.0), _cubic1(t), _cubic1(1.0 - t), _cubic2(2.0 - t))


def create_grid_np(size):
    # mirrors model/utils/nn_utils.py::create_grid -> [1, 2, size0, size1]
    gx = np.arange(size[0], dtype=np.float64) / (size[0] - 1) * 2 - 1
    gy = np.arange(size[1], dtype=np.float64) / (size[1] - 1) * 2 - 1
    gx = np.broadcast_to(gx.reshape(1, 1, -1, 1), (1, 1, size[0], size[1]))
    gy = np.broadcast_to(gy.reshape(1, 1, 1, -1), (1, 1, size[0], size[1]))
    return np.concatenate((gy, gx), axis=1).astype(np.float32)


def bicubic_upsample_matrix(n_in, n_out):
    # F.interpolate(mode='bicubic', align_corners=True) along one axis as a
    # dense [n_out, n_in] matrix (border taps clamp, weights accumulate).
    m = np.zeros((n_out, n_in), dtype=np.float64)
    scale = (n_in - 1) / (n_out - 1) if n_out > 1 else 0.0
    for o in range(n_out):
        s = o * scale
        s0 = int(np.floor(s))
        t = s - s0
        coeffs = _cubic_weights(t)
        for k in range(4):
            idx = min(max(s0 - 1 + k, 0), n_in - 1)
            m[o, idx] += coeffs[k]
    return m.astype(np.float32)


def warp_kernel(coord_ref, x_ref, out_ref, *, C, H, W, pad):
    # coord_ref: [2, tile_n]  normalized coords on the padded grid
    #            (row 0 = x / width, row 1 = y / height); pixels on the lane dim.
    # x_ref:     [C*H, W]     un-padded input, channel-major rows (r = c*H + h).
    # out_ref:   [C, tile_n]
    tile_n = out_ref.shape[-1]
    Hp = H + 2 * pad
    Wp = W + 2 * pad

    cs = coord_ref[...]                                    # [2, tile_n]
    # unnormalize (align_corners=True) onto the padded image, shifted to
    # un-padded pixel units; replication pad is realized as index clamping below.
    ix = (cs[0:1, :] + 1.0) * (0.5 * (Wp - 1)) - pad       # [1, tile_n]
    iy = (cs[1:2, :] + 1.0) * (0.5 * (Hp - 1)) - pad
    x0 = jnp.floor(ix)
    y0 = jnp.floor(iy)
    wx = _cubic_weights(ix - x0)                           # 4 x [1, tile_n]
    wy = _cubic_weights(iy - y0)
    x0i = x0.astype(jnp.int32)
    y0i = y0.astype(jnp.int32)

    # --- x direction: one-hot gather matrix [W, tile_n], built lane-dense ---
    iota_w = jax.lax.broadcasted_iota(jnp.int32, (W, tile_n), 0)
    wxt = jnp.zeros((W, tile_n), jnp.float32)
    for j in range(4):                                     # 4 cheap passes
        idx = x0i + (j - 1)
        valid = (idx >= -pad) & (idx < W + pad)            # zeros-padding mask (padded extent)
        cj = jnp.clip(idx, 0, W - 1)                       # replication pad == clamp
        wxt = wxt + jnp.where((cj == iota_w) & valid, wx[j], 0.0)

    # --- y direction: one-hot gather matrix [H, tile_n], built lane-dense ---
    iota_h = jax.lax.broadcasted_iota(jnp.int32, (H, tile_n), 0)
    wyt = jnp.zeros((H, tile_n), jnp.float32)
    for i in range(4):
        idx = y0i + (i - 1)
        valid = (idx >= -pad) & (idx < H + pad)
        ci = jnp.clip(idx, 0, H - 1)
        wyt = wyt + jnp.where((ci == iota_h) & valid, wy[i], 0.0)

    # --- single MXU matmul gathers along x for all channels & rows at once ---
    # NOTE: for large C, cast operands to bf16 (keep preferred_element_type=f32)
    # to double MXU throughput; kept f32 here since tensors are tiny.
    xg = jnp.dot(x_ref[...], wxt, preferred_element_type=jnp.float32)  # [C*H, tile_n]

    # --- y gather: per-lane weighted reduce over the H rows of each channel slab.
    # Kept strictly 2-D (static slice + multiply + sublane reduce + concat) so it
    # lowers cleanly; slices are free views when (c*H) % 8 == 0.
    rows = []
    for c in range(C):
        slab = xg[c * H:(c + 1) * H, :]                    # [H, tile_n]
        rows.append(jnp.sum(slab * wyt, axis=0, keepdims=True))
    out_ref[...] = jnp.concatenate(rows, axis=0).astype(out_ref.dtype)


def warp_pallas(x, flow, size, padding_frac=0.1, tile_n=None):
    H, W = size
    pad = int(max(size) * padding_frac)
    Hp, Wp = H + 2 * pad, W + 2 * pad
    B, C = x.shape[0], x.shape[1]
    hf, wf = flow.shape[2], flow.shape[3]
    n_out = H * W

    # separable bicubic upsample of the flow (tiny einsums, pre-kernel)
    mh = jnp.asarray(bicubic_upsample_matrix(hf, H))       # [H, hf]
    mw = jnp.asarray(bicubic_upsample_matrix(wf, W))       # [W, wf]
    up = jnp.einsum('ai,bcij,dj->bcad', mh, flow.astype(jnp.float32), mw)  # [B,2,H,W]

    # grid offsets (the cropped warp output only depends on the inner flow region)
    grid_c = jnp.asarray(create_grid_np((H, W)))                              # [1,2,H,W]
    pgrid = jnp.asarray(create_grid_np((Hp, Wp)))[:, :, pad:Hp - pad, pad:Wp - pad]
    coord = (up - grid_c + pgrid).reshape(B, 2, n_out).astype(jnp.float32)    # lane-dense

    # un-padded input, channel-major rows so the kernel does one [C*H, W] matmul
    x_r = x.reshape(B, C * H, W).astype(jnp.float32)

    if tile_n is None:
        tile_n = next((t for t in (2048, 1024, 512, 256, 128) if n_out % t == 0), n_out)
    assert n_out % tile_n == 0, "tile_n must divide H*W"
    n_tiles = n_out // tile_n

    kernel = functools.partial(warp_kernel, C=C, H=H, W=W, pad=pad)
    out_flat = pl.pallas_call(
        kernel,
        out_shape=jax.ShapeDtypeStruct((B, C, n_out), jnp.float32),
        grid=(B, n_tiles),
        in_specs=[
            pl.BlockSpec((None, 2, tile_n), lambda b, t: (b, 0, t)),
            pl.BlockSpec((None, C * H, W), lambda b, t: (b, 0, 0)),   # resident across tiles
        ],
        out_specs=pl.BlockSpec((None, C, tile_n), lambda b, t: (b, 0, t)),
        compiler_params=pltpu.CompilerParams(
            dimension_semantics=("parallel", "parallel"),   # megacore splits the grid
            vmem_limit_bytes=64 * 1024 * 1024),
        cost_estimate=pl.CostEstimate(
            flops=2 * B * C * H * W * n_out + 10 * B * (W + H + C * H) * n_out,
            transcendentals=0,
            bytes_accessed=4 * (B * C * H * W + B * 2 * n_out + B * C * n_out)),
    )(coord, x_r)
    return out_flat.reshape(B, C, H, W)


def warp_reference(x, flow, size, padding_frac=0.1):
    # pure-JAX reference of the original module's math (pad + grid_sample path)
    H, W = size
    p = int(max(size) * padding_frac)
    Hp, Wp = H + 2 * p, W + 2 * p
    B, C = x.shape[0], x.shape[1]
    hf, wf = flow.shape[2], flow.shape[3]
    mh = jnp.asarray(bicubic_upsample_matrix(hf, H))
    mw = jnp.asarray(bicubic_upsample_matrix(wf, W))
    up = jnp.einsum('ai,bcij,dj->bcad', mh, flow, mw)
    grid = jnp.asarray(create_grid_np((H, W)))
    pgrid = jnp.asarray(create_grid_np((Hp, Wp)))[:, :, p:Hp - p, p:Wp - p]
    coord = up - grid + pgrid
    ix = (coord[:, 0] + 1.0) * 0.5 * (Wp - 1)
    iy = (coord[:, 1] + 1.0) * 0.5 * (Hp - 1)
    x0 = jnp.floor(ix)
    y0 = jnp.floor(iy)
    tx = ix - x0
    ty = iy - y0
    x0 = x0.astype(jnp.int32)
    y0 = y0.astype(jnp.int32)
    wx = _cubic_weights(tx)
    wy = _cubic_weights(ty)
    xp = jnp.pad(x, ((0, 0), (0, 0), (p, p), (p, p)), mode='edge')
    xpf = xp.reshape(B, C, Hp * Wp)
    out = jnp.zeros((B, C, H, W), jnp.float32)
    for i in range(4):
        idx_y = y0 + (i - 1)
        vy = (idx_y >= 0) & (idx_y < Hp)
        cy = jnp.clip(idx_y, 0, Hp - 1)
        for j in range(4):
            idx_x = x0 + (j - 1)
            vx = (idx_x >= 0) & (idx_x < Wp)
            cx = jnp.clip(idx_x, 0, Wp - 1)
            w = wy[i] * wx[j] * (vy & vx).astype(jnp.float32)   # [B, H, W]
            fidx = (cy * Wp + cx).reshape(B, 1, H * W)
            vals = jnp.take_along_axis(
                xpf, jnp.broadcast_to(fidx, (B, C, H * W)), axis=2)
            out = out + w[:, None, :, :] * vals.reshape(B, C, H, W)
    return out


if __name__ == "__main__":
    size = (16, 16)
    key = jax.random.PRNGKey(0)
    kx, kf = jax.random.split(key)
    x = jax.random.normal(kx, (2, 4, 16, 16), dtype=jnp.float32)
    flow = jax.random.uniform(kf, (2, 2, 8, 8), dtype=jnp.float32,
                              minval=-1.0, maxval=1.0)

    # tile_n=128 -> two lane-dense pixel tiles per batch (exercises the tiled grid)
    out = jax.block_until_ready(warp_pallas(x, flow, size, tile_n=128))
    ref = jax.block_until_ready(warp_reference(x, flow, size))

    assert out.shape == (2, 4, 16, 16)
    np.testing.assert_allclose(np.asarray(out), np.asarray(ref),
                               atol=1e-3, rtol=1e-3)
    print("KERNEL_OK")
</pallas_src>

<mosaic_0001>
module attributes {stable_mosaic.version = 11 : i64} {
  func.func @warp_kernel(%arg0: i32, %arg1: i32, %arg2: memref<1x2x128xf32, #tpu.memory_space<vmem>>, %arg3: memref<1x64x16xf32, #tpu.memory_space<vmem>>, %arg4: memref<1x4x128xf32, #tpu.memory_space<vmem>>) attributes {dimension_semantics = [#tpu.dimension_semantics<parallel>, #tpu.dimension_semantics<parallel>], iteration_bounds = array<i64: 2, 2>, scalar_prefetch = 0 : i64, scratch_operands = 0 : i64, tpu.core_type = #tpu.core_type<tc>, window_params = [{transform_indices = @transform_0, window_bounds = array<i64: 1, 2, 128>}, {transform_indices = @transform_1, window_bounds = array<i64: 1, 64, 16>}, {transform_indices = @transform_2, window_bounds = array<i64: 1, 4, 128>}]} {
    %c0 = arith.constant 0 : index
    %c0_0 = arith.constant 0 : index
    %c0_1 = arith.constant 0 : index
    %0 = vector.load %arg2[%c0, %c0_0, %c0_1] : memref<1x2x128xf32, #tpu.memory_space<vmem>>, vector<1x2x128xf32>
    %1 = vector.shape_cast %0 : vector<1x2x128xf32> to vector<2x128xf32>
    %2 = vector.extract_strided_slice %1 {offsets = [0, 0], sizes = [1, 128], strides = [1, 1]} : vector<2x128xf32> to vector<1x128xf32>
    %cst = arith.constant 1.000000e+00 : f32
    %3 = vector.broadcast %cst : f32 to vector<1x128xf32>
    %4 = arith.addf %2, %3 : vector<1x128xf32>
    %cst_2 = arith.constant 8.500000e+00 : f32
    %5 = vector.broadcast %cst_2 : f32 to vector<1x128xf32>
    %6 = arith.mulf %4, %5 : vector<1x128xf32>
    %cst_3 = arith.constant 1.000000e+00 : f32
    %7 = vector.broadcast %cst_3 : f32 to vector<1x128xf32>
    %8 = arith.subf %6, %7 : vector<1x128xf32>
    %9 = vector.extract_strided_slice %1 {offsets = [1, 0], sizes = [1, 128], strides = [1, 1]} : vector<2x128xf32> to vector<1x128xf32>
    %cst_4 = arith.constant 1.000000e+00 : f32
    %10 = vector.broadcast %cst_4 : f32 to vector<1x128xf32>
    %11 = arith.addf %9, %10 : vector<1x128xf32>
    %cst_5 = arith.constant 8.500000e+00 : f32
    %12 = vector.broadcast %cst_5 : f32 to vector<1x128xf32>
    %13 = arith.mulf %11, %12 : vector<1x128xf32>
    %cst_6 = arith.constant 1.000000e+00 : f32
    %14 = vector.broadcast %cst_6 : f32 to vector<1x128xf32>
    %15 = arith.subf %13, %14 : vector<1x128xf32>
    %16 = math.floor %8 : vector<1x128xf32>
    %17 = math.floor %15 : vector<1x128xf32>
    %18 = arith.subf %8, %16 : vector<1x128xf32>
    %cst_7 = arith.constant 1.000000e+00 : f32
    %19 = vector.broadcast %cst_7 : f32 to vector<1x128xf32>
    %20 = arith.addf %18, %19 : vector<1x128xf32>
    %cst_8 = arith.constant -7.500000e-01 : f32
    %21 = vector.broadcast %cst_8 : f32 to vector<1x128xf32>
    %22 = arith.mulf %21, %20 : vector<1x128xf32>
    %cst_9 = arith.constant -3.750000e+00 : f32
    %23 = vector.broadcast %cst_9 : f32 to vector<1x128xf32>
    %24 = arith.subf %22, %23 : vector<1x128xf32>
    %25 = arith.mulf %24, %20 : vector<1x128xf32>
    %cst_10 = arith.constant -6.000000e+00 : f32
    %26 = vector.broadcast %cst_10 : f32 to vector<1x128xf32>
    %27 = arith.addf %25, %26 : vector<1x128xf32>
    %28 = arith.mulf %27, %20 : vector<1x128xf32>
    %cst_11 = arith.constant -3.000000e+00 : f32
    %29 = vector.broadcast %cst_11 : f32 to vector<1x128xf32>
    %30 = arith.subf %28, %29 : vector<1x128xf32>
    %cst_12 = arith.constant 1.250000e+00 : f32
    %31 = vector.broadcast %cst_12 : f32 to vector<1x128xf32>
    %32 = arith.mulf %31, %18 : vector<1x128xf32>
    %cst_13 = arith.constant 2.250000e+00 : f32
    %33 = vector.broadcast %cst_13 : f32 to vector<1x128xf32>
    %34 = arith.subf %32, %33 : vector<1x128xf32>
    %35 = arith.mulf %34, %18 : vector<1x128xf32>
    %36 = arith.mulf %35, %18 : vector<1x128xf32>
    %cst_14 = arith.constant 1.000000e+00 : f32
    %37 = vector.broadcast %cst_14 : f32 to vector<1x128xf32>
    %38 = arith.addf %36, %37 : vector<1x128xf32>
    %cst_15 = arith.constant 1.000000e+00 : f32
    %39 = vector.broadcast %cst_15 : f32 to vector<1x128xf32>
    %40 = arith.subf %39, %18 : vector<1x128xf32>
    %cst_16 = arith.constant 1.250000e+00 : f32
    %41 = vector.broadcast %cst_16 : f32 to vector<1x128xf32>
    %42 = arith.mulf %41, %40 : vector<1x128xf32>
    %cst_17 = arith.constant 2.250000e+00 : f32
    %43 = vector.broadcast %cst_17 : f32 to vector<1x128xf32>
    %44 = arith.subf %42, %43 : vector<1x128xf32>
    %45 = arith.mulf %44, %40 : vector<1x128xf32>
    %46 = arith.mulf %45, %40 : vector<1x128xf32>
    %cst_18 = arith.constant 1.000000e+00 : f32
    %47 = vector.broadcast %cst_18 : f32 to vector<1x128xf32>
    %48 = arith.addf %46, %47 : vector<1x128xf32>
    %cst_19 = arith.constant 2.000000e+00 : f32
    %49 = vector.broadcast %cst_19 : f32 to vector<1x128xf32>
    %50 = arith.subf %49, %18 : vector<1x128xf32>
    %cst_20 = arith.constant -7.500000e-01 : f32
    %51 = vector.broadcast %cst_20 : f32 to vector<1x128xf32>
    %52 = arith.mulf %51, %50 : vector<1x128xf32>
    %cst_21 = arith.constant -3.750000e+00 : f32
    %53 = vector.broadcast %cst_21 : f32 to vector<1x128xf32>
    %54 = arith.subf %52, %53 : vector<1x128xf32>
    %55 = arith.mulf %54, %50 : vector<1x128xf32>
    %cst_22 = arith.constant -6.000000e+00 : f32
    %56 = vector.broadcast %cst_22 : f32 to vector<1x128xf32>
    %57 = arith.addf %55, %56 : vector<1x128xf32>
    %58 = arith.mulf %57, %50 : vector<1x128xf32>
    %cst_23 = arith.constant -3.000000e+00 : f32
    %59 = vector.broadcast %cst_23 : f32 to vector<1x128xf32>
    %60 = arith.subf %58, %59 : vector<1x128xf32>
    %61 = arith.subf %15, %17 : vector<1x128xf32>
    %cst_24 = arith.constant 1.000000e+00 : f32
    %62 = vector.broadcast %cst_24 : f32 to vector<1x128xf32>
    %63 = arith.addf %61, %62 : vector<1x128xf32>
    %cst_25 = arith.constant -7.500000e-01 : f32
    %64 = vector.broadcast %cst_25 : f32 to vector<1x128xf32>
    %65 = arith.mulf %64, %63 : vector<1x128xf32>
    %cst_26 = arith.constant -3.750000e+00 : f32
    %66 = vector.broadcast %cst_26 : f32 to vector<1x128xf32>
    %67 = arith.subf %65, %66 : vector<1x128xf32>
    %68 = arith.mulf %67, %63 : vector<1x128xf32>
    %cst_27 = arith.constant -6.000000e+00 : f32
    %69 = vector.broadcast %cst_27 : f32 to vector<1x128xf32>
    %70 = arith.addf %68, %69 : vector<1x128xf32>
    %71 = arith.mulf %70, %63 : vector<1x128xf32>
    %cst_28 = arith.constant -3.000000e+00 : f32
    %72 = vector.broadcast %cst_28 : f32 to vector<1x128xf32>
    %73 = arith.subf %71, %72 : vector<1x128xf32>
    %cst_29 = arith.constant 1.250000e+00 : f32
    %74 = vector.broadcast %cst_29 : f32 to vector<1x128xf32>
    %75 = arith.mulf %74, %61 : vector<1x128xf32>
    %cst_30 = arith.constant 2.250000e+00 : f32
    %76 = vector.broadcast %cst_30 : f32 to vector<1x128xf32>
    %77 = arith.subf %75, %76 : vector<1x128xf32>
    %78 = arith.mulf %77, %61 : vector<1x128xf32>
    %79 = arith.mulf %78, %61 : vector<1x128xf32>
    %cst_31 = arith.constant 1.000000e+00 : f32
    %80 = vector.broadcast %cst_31 : f32 to vector<1x128xf32>
    %81 = arith.addf %79, %80 : vector<1x128xf32>
    %cst_32 = arith.constant 1.000000e+00 : f32
    %82 = vector.broadcast %cst_32 : f32 to vector<1x128xf32>
    %83 = arith.subf %82, %61 : vector<1x128xf32>
    %cst_33 = arith.constant 1.250000e+00 : f32
    %84 = vector.broadcast %cst_33 : f32 to vector<1x128xf32>
    %85 = arith.mulf %84, %83 : vector<1x128xf32>
    %cst_34 = arith.constant 2.250000e+00 : f32
    %86 = vector.broadcast %cst_34 : f32 to vector<1x128xf32>
    %87 = arith.subf %85, %86 : vector<1x128xf32>
    %88 = arith.mulf %87, %83 : vector<1x128xf32>
    %89 = arith.mulf %88, %83 : vector<1x128xf32>
    %cst_35 = arith.constant 1.000000e+00 : f32
    %90 = vector.broadcast %cst_35 : f32 to vector<1x128xf32>
    %91 = arith.addf %89, %90 : vector<1x128xf32>
    %cst_36 = arith.constant 2.000000e+00 : f32
    %92 = vector.broadcast %cst_36 : f32 to vector<1x128xf32>
    %93 = arith.subf %92, %61 : vector<1x128xf32>
    %cst_37 = arith.constant -7.500000e-01 : f32
    %94 = vector.broadcast %cst_37 : f32 to vector<1x128xf32>
    %95 = arith.mulf %94, %93 : vector<1x128xf32>
    %cst_38 = arith.constant -3.750000e+00 : f32
    %96 = vector.broadcast %cst_38 : f32 to vector<1x128xf32>
    %97 = arith.subf %95, %96 : vector<1x128xf32>
    %98 = arith.mulf %97, %93 : vector<1x128xf32>
    %cst_39 = arith.constant -6.000000e+00 : f32
    %99 = vector.broadcast %cst_39 : f32 to vector<1x128xf32>
    %100 = arith.addf %98, %99 : vector<1x128xf32>
    %101 = arith.mulf %100, %93 : vector<1x128xf32>
    %cst_40 = arith.constant -3.000000e+00 : f32
    %102 = vector.broadcast %cst_40 : f32 to vector<1x128xf32>
    %103 = arith.subf %101, %102 : vector<1x128xf32>
    %104 = arith.fptosi %16 : vector<1x128xf32> to vector<1x128xi32>
    %105 = arith.fptosi %17 : vector<1x128xf32> to vector<1x128xi32>
    %106 = tpu.iota {dimensions = array<i32: 0>} : vector<16x128xi32>
    %cst_41 = arith.constant 0.000000e+00 : f32
    %107 = vector.broadcast %cst_41 : f32 to vector<16x128xf32>
    %c-1_i32 = arith.constant -1 : i32
    %108 = vector.broadcast %c-1_i32 : i32 to vector<1x128xi32>
    %109 = arith.addi %104, %108 : vector<1x128xi32>
    %c-1_i32_42 = arith.constant -1 : i32
    %110 = vector.broadcast %c-1_i32_42 : i32 to vector<1x128xi32>
    %111 = arith.cmpi sge, %109, %110 : vector<1x128xi32>
    %c17_i32 = arith.constant 17 : i32
    %112 = vector.broadcast %c17_i32 : i32 to vector<1x128xi32>
    %113 = arith.cmpi slt, %109, %112 : vector<1x128xi32>
    %114 = arith.andi %111, %113 : vector<1x128xi1>
    %c0_i32 = arith.constant 0 : i32
    %c15_i32 = arith.constant 15 : i32
    %115 = vector.broadcast %c0_i32 : i32 to vector<1x128xi32>
    %116 = arith.maxsi %115, %109 : vector<1x128xi32>
    %117 = vector.broadcast %c15_i32 : i32 to vector<1x128xi32>
    %118 = arith.minsi %117, %116 : vector<1x128xi32>
    %119 = vector.broadcast %118 : vector<1x128xi32> to vector<16x128xi32>
    %120 = arith.cmpi eq, %119, %106 : vector<16x128xi32>
    %121 = vector.broadcast %114 : vector<1x128xi1> to vector<16x128xi1>
    %122 = arith.andi %120, %121 : vector<16x128xi1>
    %cst_43 = arith.constant 0.000000e+00 : f32
    %123 = vector.shape_cast %30 : vector<1x128xf32> to vector<1x128xf32>
    %124 = vector.broadcast %123 : vector<1x128xf32> to vector<16x128xf32>
    %125 = vector.broadcast %cst_43 : f32 to vector<16x128xf32>
    %126 = arith.select %122, %124, %125 : vector<16x128xi1>, vector<16x128xf32>
    %127 = arith.addf %107, %126 : vector<16x128xf32>
    %c0_i32_44 = arith.constant 0 : i32
    %128 = vector.broadcast %c0_i32_44 : i32 to vector<1x128xi32>
    %129 = arith.addi %104, %128 : vector<1x128xi32>
    %c-1_i32_45 = arith.constant -1 : i32
    %130 = vector.broadcast %c-1_i32_45 : i32 to vector<1x128xi32>
    %131 = arith.cmpi sge, %129, %130 : vector<1x128xi32>
    %c17_i32_46 = arith.constant 17 : i32
    %132 = vector.broadcast %c17_i32_46 : i32 to vector<1x128xi32>
    %133 = arith.cmpi slt, %129, %132 : vector<1x128xi32>
    %134 = arith.andi %131, %133 : vector<1x128xi1>
    %c0_i32_47 = arith.constant 0 : i32
    %c15_i32_48 = arith.constant 15 : i32
    %135 = vector.broadcast %c0_i32_47 : i32 to vector<1x128xi32>
    %136 = arith.maxsi %135, %129 : vector<1x128xi32>
    %137 = vector.broadcast %c15_i32_48 : i32 to vector<1x128xi32>
    %138 = arith.minsi %137, %136 : vector<1x128xi32>
    %139 = vector.broadcast %138 : vector<1x128xi32> to vector<16x128xi32>
    %140 = arith.cmpi eq, %139, %106 : vector<16x128xi32>
    %141 = vector.broadcast %134 : vector<1x128xi1> to vector<16x128xi1>
    %142 = arith.andi %140, %141 : vector<16x128xi1>
    %cst_49 = arith.constant 0.000000e+00 : f32
    %143 = vector.shape_cast %38 : vector<1x128xf32> to vector<1x128xf32>
    %144 = vector.broadcast %143 : vector<1x128xf32> to vector<16x128xf32>
    %145 = vector.broadcast %cst_49 : f32 to vector<16x128xf32>
    %146 = arith.select %142, %144, %145 : vector<16x128xi1>, vector<16x128xf32>
    %147 = arith.addf %127, %146 : vector<16x128xf32>
    %c1_i32 = arith.constant 1 : i32
    %148 = vector.broadcast %c1_i32 : i32 to vector<1x128xi32>
    %149 = arith.addi %104, %148 : vector<1x128xi32>
    %c-1_i32_50 = arith.constant -1 : i32
    %150 = vector.broadcast %c-1_i32_50 : i32 to vector<1x128xi32>
    %151 = arith.cmpi sge, %149, %150 : vector<1x128xi32>
    %c17_i32_51 = arith.constant 17 : i32
    %152 = vector.broadcast %c17_i32_51 : i32 to vector<1x128xi32>
    %153 = arith.cmpi slt, %149, %152 : vector<1x128xi32>
    %154 = arith.andi %151, %153 : vector<1x128xi1>
    %c0_i32_52 = arith.constant 0 : i32
    %c15_i32_53 = arith.constant 15 : i32
    %155 = vector.broadcast %c0_i32_52 : i32 to vector<1x128xi32>
    %156 = arith.maxsi %155, %149 : vector<1x128xi32>
    %157 = vector.broadcast %c15_i32_53 : i32 to vector<1x128xi32>
    %158 = arith.minsi %157, %156 : vector<1x128xi32>
    %159 = vector.broadcast %158 : vector<1x128xi32> to vector<16x128xi32>
    %160 = arith.cmpi eq, %159, %106 : vector<16x128xi32>
    %161 = vector.broadcast %154 : vector<1x128xi1> to vector<16x128xi1>
    %162 = arith.andi %160, %161 : vector<16x128xi1>
    %cst_54 = arith.constant 0.000000e+00 : f32
    %163 = vector.shape_cast %48 : vector<1x128xf32> to vector<1x128xf32>
    %164 = vector.broadcast %163 : vector<1x128xf32> to vector<16x128xf32>
    %165 = vector.broadcast %cst_54 : f32 to vector<16x128xf32>
    %166 = arith.select %162, %164, %165 : vector<16x128xi1>, vector<16x128xf32>
    %167 = arith.addf %147, %166 : vector<16x128xf32>
    %c2_i32 = arith.constant 2 : i32
    %168 = vector.broadcast %c2_i32 : i32 to vector<1x128xi32>
    %169 = arith.addi %104, %168 : vector<1x128xi32>
    %c-1_i32_55 = arith.constant -1 : i32
    %170 = vector.broadcast %c-1_i32_55 : i32 to vector<1x128xi32>
    %171 = arith.cmpi sge, %169, %170 : vector<1x128xi32>
    %c17_i32_56 = arith.constant 17 : i32
    %172 = vector.broadcast %c17_i32_56 : i32 to vector<1x128xi32>
    %173 = arith.cmpi slt, %169, %172 : vector<1x128xi32>
    %174 = arith.andi %171, %173 : vector<1x128xi1>
    %c0_i32_57 = arith.constant 0 : i32
    %c15_i32_58 = arith.constant 15 : i32
    %175 = vector.broadcast %c0_i32_57 : i32 to vector<1x128xi32>
    %176 = arith.maxsi %175, %169 : vector<1x128xi32>
    %177 = vector.broadcast %c15_i32_58 : i32 to vector<1x128xi32>
    %178 = arith.minsi %177, %176 : vector<1x128xi32>
    %179 = vector.broadcast %178 : vector<1x128xi32> to vector<16x128xi32>
    %180 = arith.cmpi eq, %179, %106 : vector<16x128xi32>
    %181 = vector.broadcast %174 : vector<1x128xi1> to vector<16x128xi1>
    %182 = arith.andi %180, %181 : vector<16x128xi1>
    %cst_59 = arith.constant 0.000000e+00 : f32
    %183 = vector.shape_cast %60 : vector<1x128xf32> to vector<1x128xf32>
    %184 = vector.broadcast %183 : vector<1x128xf32> to vector<16x128xf32>
    %185 = vector.broadcast %cst_59 : f32 to vector<16x128xf32>
    %186 = arith.select %182, %184, %185 : vector<16x128xi1>, vector<16x128xf32>
    %187 = arith.addf %167, %186 : vector<16x128xf32>
    %188 = tpu.iota {dimensions = array<i32: 0>} : vector<16x128xi32>
    %cst_60 = arith.constant 0.000000e+00 : f32
    %189 = vector.broadcast %cst_60 : f32 to vector<16x128xf32>
    %c-1_i32_61 = arith.constant -1 : i32
    %190 = vector.broadcast %c-1_i32_61 : i32 to vector<1x128xi32>
    %191 = arith.addi %105, %190 : vector<1x128xi32>
    %c-1_i32_62 = arith.constant -1 : i32
    %192 = vector.broadcast %c-1_i32_62 : i32 to vector<1x128xi32>
    %193 = arith.cmpi sge, %191, %192 : vector<1x128xi32>
    %c17_i32_63 = arith.constant 17 : i32
    %194 = vector.broadcast %c17_i32_63 : i32 to vector<1x128xi32>
    %195 = arith.cmpi slt, %191, %194 : vector<1x128xi32>
    %196 = arith.andi %193, %195 : vector<1x128xi1>
    %c0_i32_64 = arith.constant 0 : i32
    %c15_i32_65 = arith.constant 15 : i32
    %197 = vector.broadcast %c0_i32_64 : i32 to vector<1x128xi32>
    %198 = arith.maxsi %197, %191 : vector<1x128xi32>
    %199 = vector.broadcast %c15_i32_65 : i32 to vector<1x128xi32>
    %200 = arith.minsi %199, %198 : vector<1x128xi32>
    %201 = vector.broadcast %200 : vector<1x128xi32> to vector<16x128xi32>
    %202 = arith.cmpi eq, %201, %188 : vector<16x128xi32>
    %203 = vector.broadcast %196 : vector<1x128xi1> to vector<16x128xi1>
    %204 = arith.andi %202, %203 : vector<16x128xi1>
    %cst_66 = arith.constant 0.000000e+00 : f32
    %205 = vector.shape_cast %73 : vector<1x128xf32> to vector<1x128xf32>
    %206 = vector.broadcast %205 : vector<1x128xf32> to vector<16x128xf32>
    %207 = vector.broadcast %cst_66 : f32 to vector<16x128xf32>
    %208 = arith.select %204, %206, %207 : vector<16x128xi1>, vector<16x128xf32>
    %209 = arith.addf %189, %208 : vector<16x128xf32>
    %c0_i32_67 = arith.constant 0 : i32
    %210 = vector.broadcast %c0_i32_67 : i32 to vector<1x128xi32>
    %211 = arith.addi %105, %210 : vector<1x128xi32>
    %c-1_i32_68 = arith.constant -1 : i32
    %212 = vector.broadcast %c-1_i32_68 : i32 to vector<1x128xi32>
    %213 = arith.cmpi sge, %211, %212 : vector<1x128xi32>
    %c17_i32_69 = arith.constant 17 : i32
    %214 = vector.broadcast %c17_i32_69 : i32 to vector<1x128xi32>
    %215 = arith.cmpi slt, %211, %214 : vector<1x128xi32>
    %216 = arith.andi %213, %215 : vector<1x128xi1>
    %c0_i32_70 = arith.constant 0 : i32
    %c15_i32_71 = arith.constant 15 : i32
    %217 = vector.broadcast %c0_i32_70 : i32 to vector<1x128xi32>
    %218 = arith.maxsi %217, %211 : vector<1x128xi32>
    %219 = vector.broadcast %c15_i32_71 : i32 to vector<1x128xi32>
    %220 = arith.minsi %219, %218 : vector<1x128xi32>
    %221 = vector.broadcast %220 : vector<1x128xi32> to vector<16x128xi32>
    %222 = arith.cmpi eq, %221, %188 : vector<16x128xi32>
    %223 = vector.broadcast %216 : vector<1x128xi1> to vector<16x128xi1>
    %224 = arith.andi %222, %223 : vector<16x128xi1>
    %cst_72 = arith.constant 0.000000e+00 : f32
    %225 = vector.shape_cast %81 : vector<1x128xf32> to vector<1x128xf32>
    %226 = vector.broadcast %225 : vector<1x128xf32> to vector<16x128xf32>
    %227 = vector.broadcast %cst_72 : f32 to vector<16x128xf32>
    %228 = arith.select %224, %226, %227 : vector<16x128xi1>, vector<16x128xf32>
    %229 = arith.addf %209, %228 : vector<16x128xf32>
    %c1_i32_73 = arith.constant 1 : i32
    %230 = vector.broadcast %c1_i32_73 : i32 to vector<1x128xi32>
    %231 = arith.addi %105, %230 : vector<1x128xi32>
    %c-1_i32_74 = arith.constant -1 : i32
    %232 = vector.broadcast %c-1_i32_74 : i32 to vector<1x128xi32>
    %233 = arith.cmpi sge, %231, %232 : vector<1x128xi32>
    %c17_i32_75 = arith.constant 17 : i32
    %234 = vector.broadcast %c17_i32_75 : i32 to vector<1x128xi32>
    %235 = arith.cmpi slt, %231, %234 : vector<1x128xi32>
    %236 = arith.andi %233, %235 : vector<1x128xi1>
    %c0_i32_76 = arith.constant 0 : i32
    %c15_i32_77 = arith.constant 15 : i32
    %237 = vector.broadcast %c0_i32_76 : i32 to vector<1x128xi32>
    %238 = arith.maxsi %237, %231 : vector<1x128xi32>
    %239 = vector.broadcast %c15_i32_77 : i32 to vector<1x128xi32>
    %240 = arith.minsi %239, %238 : vector<1x128xi32>
    %241 = vector.broadcast %240 : vector<1x128xi32> to vector<16x128xi32>
    %242 = arith.cmpi eq, %241, %188 : vector<16x128xi32>
    %243 = vector.broadcast %236 : vector<1x128xi1> to vector<16x128xi1>
    %244 = arith.andi %242, %243 : vector<16x128xi1>
    %cst_78 = arith.constant 0.000000e+00 : f32
    %245 = vector.shape_cast %91 : vector<1x128xf32> to vector<1x128xf32>
    %246 = vector.broadcast %245 : vector<1x128xf32> to vector<16x128xf32>
    %247 = vector.broadcast %cst_78 : f32 to vector<16x128xf32>
    %248 = arith.select %244, %246, %247 : vector<16x128xi1>, vector<16x128xf32>
    %249 = arith.addf %229, %248 : vector<16x128xf32>
    %c2_i32_79 = arith.constant 2 : i32
    %250 = vector.broadcast %c2_i32_79 : i32 to vector<1x128xi32>
    %251 = arith.addi %105, %250 : vector<1x128xi32>
    %c-1_i32_80 = arith.constant -1 : i32
    %252 = vector.broadcast %c-1_i32_80 : i32 to vector<1x128xi32>
    %253 = arith.cmpi sge, %251, %252 : vector<1x128xi32>
    %c17_i32_81 = arith.constant 17 : i32
    %254 = vector.broadcast %c17_i32_81 : i32 to vector<1x128xi32>
    %255 = arith.cmpi slt, %251, %254 : vector<1x128xi32>
    %256 = arith.andi %253, %255 : vector<1x128xi1>
    %c0_i32_82 = arith.constant 0 : i32
    %c15_i32_83 = arith.constant 15 : i32
    %257 = vector.broadcast %c0_i32_82 : i32 to vector<1x128xi32>
    %258 = arith.maxsi %257, %251 : vector<1x128xi32>
    %259 = vector.broadcast %c15_i32_83 : i32 to vector<1x128xi32>
    %260 = arith.minsi %259, %258 : vector<1x128xi32>
    %261 = vector.broadcast %260 : vector<1x128xi32> to vector<16x128xi32>
    %262 = arith.cmpi eq, %261, %188 : vector<16x128xi32>
    %263 = vector.broadcast %256 : vector<1x128xi1> to vector<16x128xi1>
    %264 = arith.andi %262, %263 : vector<16x128xi1>
    %cst_84 = arith.constant 0.000000e+00 : f32
    %265 = vector.shape_cast %103 : vector<1x128xf32> to vector<1x128xf32>
    %266 = vector.broadcast %265 : vector<1x128xf32> to vector<16x128xf32>
    %267 = vector.broadcast %cst_84 : f32 to vector<16x128xf32>
    %268 = arith.select %264, %266, %267 : vector<16x128xi1>, vector<16x128xf32>
    %269 = arith.addf %249, %268 : vector<16x128xf32>
    %c0_85 = arith.constant 0 : index
    %c0_86 = arith.constant 0 : index
    %c0_87 = arith.constant 0 : index
    %270 = vector.load %arg3[%c0_85, %c0_86, %c0_87] : memref<1x64x16xf32, #tpu.memory_space<vmem>>, vector<1x64x16xf32>
    %271 = vector.shape_cast %270 : vector<1x64x16xf32> to vector<64x16xf32>
    %cst_88 = arith.constant dense<0.000000e+00> : vector<64x128xf32>
    %272 = tpu.matmul %271, %187, %cst_88 {dimension_numbers = #tpu.dot_dimension_numbers<[1], [0], [0], [1], [0, 0, 1, 1], [], []>} : vector<64x16xf32>, vector<16x128xf32>, vector<64x128xf32> -> vector<64x128xf32>
    %273 = vector.extract_strided_slice %272 {offsets = [0, 0], sizes = [16, 128], strides = [1, 1]} : vector<64x128xf32> to vector<16x128xf32>
    %274 = arith.mulf %273, %269 : vector<16x128xf32>
    %cst_89 = arith.constant dense<0.000000e+00> : vector<128xf32>
    %275 = vector.multi_reduction <add>, %274, %cst_89 [0] : vector<16x128xf32> to vector<128xf32>
    %276 = vector.shape_cast %275 : vector<128xf32> to vector<1x128xf32>
    %277 = vector.extract_strided_slice %272 {offsets = [16, 0], sizes = [16, 128], strides = [1, 1]} : vector<64x128xf32> to vector<16x128xf32>
    %278 = arith.mulf %277, %269 : vector<16x128xf32>
    %cst_90 = arith.constant dense<0.000000e+00> : vector<128xf32>
    %279 = vector.multi_reduction <add>, %278, %cst_90 [0] : vector<16x128xf32> to vector<128xf32>
    %280 = vector.shape_cast %279 : vector<128xf32> to vector<1x128xf32>
    %281 = vector.extract_strided_slice %272 {offsets = [32, 0], sizes = [16, 128], strides = [1, 1]} : vector<64x128xf32> to vector<16x128xf32>
    %282 = arith.mulf %281, %269 : vector<16x128xf32>
    %cst_91 = arith.constant dense<0.000000e+00> : vector<128xf32>
    %283 = vector.multi_reduction <add>, %282, %cst_91 [0] : vector<16x128xf32> to vector<128xf32>
    %284 = vector.shape_cast %283 : vector<128xf32> to vector<1x128xf32>
    %285 = vector.extract_strided_slice %272 {offsets = [48, 0], sizes = [16, 128], strides = [1, 1]} : vector<64x128xf32> to vector<16x128xf32>
    %286 = arith.mulf %285, %269 : vector<16x128xf32>
    %cst_92 = arith.constant dense<0.000000e+00> : vector<128xf32>
    %287 = vector.multi_reduction <add>, %286, %cst_92 [0] : vector<16x128xf32> to vector<128xf32>
    %288 = vector.shape_cast %287 : vector<128xf32> to vector<1x128xf32>
    %289 = tpu.concatenate %276, %280, %284, %288 in 0 : vector<1x128xf32>, vector<1x128xf32>, vector<1x128xf32>, vector<1x128xf32> -> vector<4x128xf32>
    %c0_93 = arith.constant 0 : index
    %c0_94 = arith.constant 0 : index
    %c0_95 = arith.constant 0 : index
    %290 = vector.load %arg4[%c0_93, %c0_94, %c0_95] : memref<1x4x128xf32, #tpu.memory_space<vmem>>, vector<1x4x128xf32>
    %291 = vector.shape_cast %290 : vector<1x4x128xf32> to vector<4x128xf32>
    %292 = vector.shape_cast %289 : vector<4x128xf32> to vector<1x4x128xf32>
    tpu.vector_store %arg4[%c0_93, %c0_94, %c0_95], %292 {strides = array<i32>} : memref<1x4x128xf32, #tpu.memory_space<vmem>>, vector<1x4x128xf32>,
    return
  }
  func.func @transform_0(%arg0: i32, %arg1: i32) -> (i32, i32, i32) {
    %c0_i32 = arith.constant 0 : i32
    %c0_i32_0 = arith.constant 0 : i32
    return %arg0, %c0_i32, %arg1 : i32, i32, i32
  }
  func.func @transform_1(%arg0: i32, %arg1: i32) -> (i32, i32, i32) {
    %c0_i32 = arith.constant 0 : i32
    %c0_i32_0 = arith.constant 0 : i32
    %c0_i32_1 = arith.constant 0 : i32
    return %arg0, %c0_i32, %c0_i32_0 : i32, i32, i32
  }
  func.func @transform_2(%arg0: i32, %arg1: i32) -> (i32, i32, i32) {
    %c0_i32 = arith.constant 0 : i32
    %c0_i32_0 = arith.constant 0 : i32
    return %arg0, %c0_i32, %arg1 : i32, i32, i32
  }
}

</mosaic_0001>

<bundles_post_ra>
// kernel: tpu_custom_call.1
= control target key start
LH: loop header
LB: loop body
LE: loop exit
PB: predicated region body
PF: predicated region fallthrough
CT: control target
= control target key end

     0   :  { %7 = vsyncpa [#allocation3], 0  ;;  %s1123_s0 = inlined_call_operand.vmem [shape: f32[2,2,256], index: 0, kind: input, shape index: {}]   ;;  %s1124_s1 = inlined_call_operand.vmem [shape: f32[2,64,16], index: 1, kind: input, shape index: {}]   ;;  %s1125_s2 = inlined_call_operand.hbm [shape: f32[2,4,256], index: 2, kind: output, shape index: {}]  }
   0x1   :  { %9 = vsyncpa [#allocation3 + $0x1], 0  ;;  %s801_s9 = smov 0   ;;  %s803_s10 = smov 0  }
   0x2   :  { %s805_s11 = smov 0   ;;  %s807_s12 = smov 0  }
   0x3   :  { %s809_s13 = smov 0   ;;  %s811_s14 = smov 0  }
   0x4   :  { %s813_s15 = smov 0   ;;  %s815_s16 = smov 0  }
   0x5 LB: > { %s578_s17 = sadd.s32 4294967295, %s783_s16   ;;  %s579_s18 = sadd.s32 4294967294, %s783_s16   ;;  %s783_s16 = sphi %s815_s16, %s15_s16   ;;  %s779_s15 = sphi %s813_s15, %s1160_s15   ;;  %s775_s14 = sphi %s811_s14, %s1159_s14   ;;  %s771_s13 = sphi %s809_s13, %s1158_s13   ;;  %s767_s12 = sphi %s807_s12, %s1157_s12   ;;  %s763_s11 = sphi %s805_s11, %s1156_s11   ;;  %s759_s10 = sphi %s803_s10, %s1155_s10   ;;  %s755_s9 = sphi %s801_s9, %s1154_s9  }
   0x6   : > { %s24_s19 = sadd.s32 1, %s775_s14  ;;  %s27_s20 = sadd.s32 1, %s779_s15 }
   0x7   : > { %p25_p0 = scmp.ge.s32.totalorder %s24_s19, 2  ;;  %p100_p1 = scmp.ne.s32.totalorder %s763_s11, %s759_s10 }
   0x8   : > { %p101_p2 = scmp.eq.s32.totalorder %s578_s17, 3  ;;  %p106_p5 = scmp.ne.s32.totalorder %s759_s10, %s755_s9 }
   0x9   : > { %s1162_s19 = smov (%p25_p0, %s24_s19), 0  ;;  %s1164_s20 = smov (!%p25_p0, %s27_s20), %s779_s15 }
   0xa   : > { %s86_s21 = ssub.s32 %s775_s14, %s1162_s19  ;;  %p852_p3 = por %p101_p2, %p100_p1 }
   0xb   : > { %p29_p4 = scmp.ge.s32.totalorder %s1164_s20, 2  ;;  %p107_p6 = scmp.eq.s32.totalorder %s579_s18, 3 }
   0xc   : > { %p582_p7 = scmp.ge.s32.totalorder %s783_s16, 1  ;;  %p144_p9 = scmp.lt.s32.totalorder %s783_s16, 5 }
   0xd   : > { %s1166_s20 = smov (%p29_p4, %s1164_s20), 0  ;;  %p861_p8 = por %p107_p6, %p106_p5 }
   0xe   : > { %s85_s24 = ssub.s32 %s779_s15, %s1166_s20  ;;  %s90_s25 = sadd.s32 1, %s763_s11 }
   0xf   : > { %s87_s26 = sor.u32 %s86_s21, %s85_s24  ;;  %p145_p10 = pnand %p582_p7, %p144_p9 }
  0x10   : > { %p88_p11 = scmp.eq.s32.totalorder %s87_s26, 0  ;;  %p174_p12 = scmp.lt.s32.totalorder (!%p145_p10), %s771_s13, 1 }
  0x11   : > { %148 = sbr.rel (%p145_p10) target bundleno = 232 (0xe8), region = 28  ;;  %p176_p13 = scmp.lt.s32.totalorder (!%p145_p10), %s767_s12, 1 }
  0x12   : > { %s870_s27 = scalar_select %p88_p11, %s763_s11, %s90_s25  }
  0x13   : > { %s604_s24 = sshll.u32 (!%p145_p10), %s771_s13, 1  ;;  %s171_s25 = sand.u32 (!%p145_p10), 1, %s759_s10  }
  0x14   : > { %s481_s26 = sadd.s32 (!%p145_p10), %s767_s12, %s604_s24  ;;  %s471_s6 = scalar_lea.sflag (!%p145_p10), [#allocation3], %s171_s25 }
  0x16   : > { %s875_s28 = scalar_select %p174_p12, %s771_s13, 1  ;;  %v219_v2 = vlaneseq  ;;  %v785_v25 = vmov 0  }
  0x17   : > { %s177_s29 = scalar_select %p176_p13, %s767_s12, 1 }
  0x18   : > { %s584_s30 = sshll.u32 %s875_s28, 1  ;;  %v882_v5 = vshrl.u32 %v219_v2, 7  ;;  %s608_s8 = sshll.u32 %s875_s28, 6 }
  0x19   : > { %s179_s3 = sadd.s32 %s584_s30, %s177_s29  ;;  %s1003_s21 = scalar_lea.vmem %s1124_s1, %s608_s8 }
  0x1a   : > { %s585_s4 = sshll.u32 %s179_s3, 1  ;;  %v885_v9 = vadd.s32 8, %v882_v5  ;;  %v353_v40 = vld [vmem:[%s1003_s21] sm:$0xff]  ;;  %v354_v52 = vld [vmem:[%s1003_s21 + $0x8] sm:$0xff]  ;;  %s583_s28 = sshll.u32 %s171_s25, 2 }
  0x1b   : > { %s181_s7 = scalar_lea.vmem %s1123_s0, %s585_s4  ;;  %s605_s29 = sshll.u32 %s481_s26, 2 }
  0x1c   : > { %v187_v0 = vld [vmem:[%s181_s7] sm:$0x3]  ;;  %s483_s12 = scalar_lea.hbm %s1125_s2, %s605_s29  ;;  %s173_s3 = scalar_lea.vmem [#allocation2], %s583_s28 }
  0x1d   : > { %v188_v1 = vadd.f32 1.0, %v187_v0  ;;  %s485_s4 = sshll.u32 %s173_s3, 4  ;;  %s487_s5 = sshll.u32 %s483_s12, 4  ;;  %s486_s4 = int_to_ptr.vmem [resolvable:$true] %s485_s4  ;;  %s488_s5 = int_to_ptr.hbm [resolvable:$true] %s487_s5 }
  0x1e   : > { %s703_s7 = sshra.s32 %s488_s5, 4  ;;  %s704_s7 = int_to_ptr.hbm [resolvable:$true] %s703_s7 }
  0x1f   : > { %v189_v3 = vmul.f32 8.5, %v188_v1  ;;  %s705_s8 = scalar_lea.hbm %s704_s7, 4  ;;  %p710_p4 = scmp.lt.s32.totalorder %s704_s7, %s1125_s2 }
  0x20   : > { %p706_p0 = scmp.ne.s32.totalorder %s704_s7, %s705_s8 }
  0x21   : > { %v588_v4 = vadd.f32 -1.0, %v189_v3 }
  0x22   : > { %p707_p1 = pnand %p706_p0, %p852_p3 }
  0x23   : > { %v191_v6 = vfloor.f32 %v588_v4 }
  0x24   : > { %p708_p2 = pneg %p707_p1 }
  0x25   : > { %v192_v7 = vsub.f32 %v588_v4, %v191_v6  ;;  %v616_v8 = vcvt.f32.s32 %v191_v6 }
  0x27   : > { %v193_v10 = vadd.f32 1.0, %v192_v7  ;;  %v200_v11 = vmul.f32 1.25, %v192_v7  ;;  %v205_v12 = vsub.f32 1.0, %v192_v7  ;;  %v211_v13 = vsub.f32 2.0, %v192_v7 }
  0x28   : > { %v222_v14 = vadd.s32 4294967295, %v616_v8  ;;  %vm243_vm0 = vcmp.ge.s32.totalorder %v616_v8, 4294967295  ;;  %vm244_vm1 = vcmp.lt.s32.totalorder %v616_v8, 17  ;;  %vm246_vm2 = vcmp.gt.s32.totalorder %v616_v8, 0 }
  0x29   : > { %v194_v15 = vmul.f32 -0.75, %v193_v10  ;;  %v591_v16 = vadd.f32 -2.25, %v200_v11  ;;  %v206_v17 = vmul.f32 1.25, %v205_v12  ;;  %v212_v18 = vmul.f32 -0.75, %v211_v13  ;;  %vm245_vm3 = vmand %vm243_vm0, %vm244_vm1 }
  0x2a   : > { %vm223_vm4 = vcmp.ge.s32.totalorder %v222_v14, 4294967295  ;;  %vm224_vm5 = vcmp.lt.s32.totalorder %v222_v14, 17  ;;  %vm226_vm6 = vcmp.gt.s32.totalorder %v222_v14, 0  ;;  %v247_v19 = vsel %vm246_vm2, %v616_v8, 0 }
  0x2b   : > { %v589_v20 = vadd.f32 3.75, %v194_v15  ;;  %v202_v21 = vmul.f32 %v591_v16, %v192_v7  ;;  %v592_v22 = vadd.f32 -2.25, %v206_v17  ;;  %v593_v23 = vadd.f32 3.75, %v212_v18  ;;  %vm225_vm7 = vmand %vm223_vm4, %vm224_vm5 }
  0x2c   : > { %v227_v24 = vsel %vm226_vm6, %v222_v14, 0  ;;  %v887_v26 = vsel %vm225_vm7, 1, %v785_v25  ;;  %vm248_vm8 = vcmp.lt.s32.totalorder %v247_v19, 15  ;;  %v889_v27 = vsel %vm245_vm3, 1, %v785_v25 }
  0x2d   : > { %v196_v28 = vmul.f32 %v589_v20, %v193_v10  ;;  %v203_v29 = vmul.f32 %v202_v21, %v192_v7  ;;  %v208_v30 = vmul.f32 %v592_v22, %v205_v12  ;;  %v214_v31 = vmul.f32 %v593_v23, %v211_v13 }
  0x2e   : > { %vm228_vm9 = vcmp.lt.s32.totalorder %v227_v24, 15  ;;  %v234_v32 = vperm.slane %v887_v26, 0  ;;  %v892_v33 = vsel %vm248_vm8, %v247_v19, 15  ;;  %v254_v34 = vperm.slane %v889_v27, 0 }
  0x2f   : > { %v197_v35 = vadd.f32 -6.0, %v196_v28  ;;  %v895_v36 = vadd.f32 1.0, %v203_v29  ;;  %v209_v37 = vmul.f32 %v208_v30, %v205_v12  ;;  %v215_v38 = vadd.f32 -6.0, %v214_v31 }
  0x30   : > { %v897_v39 = vsel %vm228_vm9, %v227_v24, 15  ;;  %vm899_vm10 = vcmp.eq.s32.totalorder %v234_v32, 1  ;;  %v250_v41 = vperm.slane %v892_v33, 0  ;;  %vm904_vm11 = vcmp.eq.s32.totalorder %v254_v34, 1 }
  0x31   : > { %v198_v43 = vmul.f32 %v197_v35, %v193_v10  ;;  %v908_v44 = vadd.f32 1.0, %v209_v37  ;;  %v216_v45 = vmul.f32 %v215_v38, %v211_v13  ;;  %v230_v46 = vperm.slane %v897_v39, 0 }
  0x32   : > { %vm252_vm12 = vcmp.eq.s32.totalorder %v250_v41, %v885_v9  ;;  %v258_v47 = vperm.slane %v895_v36, 0  ;;  %v263_v48 = vadd.s32 1, %v616_v8  ;;  %v284_v49 = vadd.s32 2, %v616_v8 }
  0x33   : > { %v913_v50 = vadd.f32 3.0, %v198_v43  ;;  %v915_v51 = vadd.f32 3.0, %v216_v45  ;;  %vm918_vm13 = vcmp.eq.s32.totalorder %v230_v46, %v885_v9  ;;  %vm257_vm14 = vmand %vm252_vm12, %vm904_vm11  ;;  %v279_v53 = vperm.slane %v908_v44, 0 }
  0x34   : > { %vm237_vm15 = vmand %vm918_vm13, %vm899_vm10  ;;  %v260_v54 = vsel %vm257_vm14, %v258_v47, 0.0  ;;  %vm264_vm0 = vcmp.ge.s32.totalorder %v263_v48, 4294967295  ;;  %vm265_vm1 = vcmp.lt.s32.totalorder %v263_v48, 17  ;;  %vm267_vm2 = vcmp.gt.s32.totalorder %v263_v48, 0 }
  0x35   : > { %v238_v55 = vperm.slane %v913_v50, 0  ;;  %vm266_vm3 = vmand %vm264_vm0, %vm265_vm1  ;;  %v268_v56 = vsel %vm267_vm2, %v263_v48, 0  ;;  %vm285_vm4 = vcmp.ge.s32.totalorder %v284_v49, 4294967295  ;;  %vm286_vm5 = vcmp.lt.s32.totalorder %v284_v49, 17 }
  0x36   : > { %vm269_vm6 = vcmp.lt.s32.totalorder %v268_v56, 15  ;;  %v930_v57 = vsel %vm266_vm3, 1, %v785_v25  ;;  %vm287_vm7 = vmand %vm285_vm4, %vm286_vm5  ;;  %vm288_vm8 = vcmp.gt.s32.totalorder %v284_v49, 0  ;;  %v300_v58 = vperm.slane %v915_v51, 0 }
  0x37   : > { %v240_v59 = vsel %vm237_vm15, %v238_v55, 0.0  ;;  %v933_v60 = vsel %vm269_vm6, %v268_v56, 15  ;;  %v275_v61 = vperm.slane %v930_v57, 0  ;;  %v289_v62 = vsel %vm288_vm8, %v284_v49, 0 }
  0x38   : > { %v262_v63 = vadd.f32 %v260_v54, %v240_v59  ;;  %v271_v0 = vperm.slane %v933_v60, 0  ;;  %vm290_vm9 = vcmp.lt.s32.totalorder %v289_v62, 15  ;;  %v937_v1 = vsel %vm287_vm7, 1, %v785_v25  ;;  %v358_v54 = vld [vmem:[%s1003_s21 + $0x28] sm:$0xff] }
  0x39   : > { %vm939_vm12 = vcmp.eq.s32.totalorder %v275_v61, 1  ;;  %v943_v3 = vsel %vm290_vm9, %v289_v62, 15  ;;  %v296_v4 = vperm.slane %v937_v1, 0  ;;  %vm231_vm13 = vcmp.eq.s32.totalorder %v230_v46, %v882_v5  ;;  %v359_v46 = vld [vmem:[%s1003_s21 + $0x30] sm:$0xff] }
  0x3a   : > { %vm273_vm14 = vcmp.eq.s32.totalorder %v271_v0, %v885_v9  ;;  %v292_v6 = vperm.slane %v943_v3, 0  ;;  %vm236_vm15 = vmand %vm231_vm13, %vm899_vm10  ;;  %vm251_vm0 = vcmp.eq.s32.totalorder %v250_v41, %v882_v5  ;;  %vm953_vm1 = vcmp.eq.s32.totalorder %v271_v0, %v882_v5  ;;  %v355_v41 = vld [vmem:[%s1003_s21 + $0x10] sm:$0xff] }
  0x3b   : > { %vm278_vm2 = vmand %vm273_vm14, %vm939_vm12  ;;  %vm959_vm3 = vcmp.eq.s32.totalorder %v296_v4, 1  ;;  %v239_v10 = vsel %vm236_vm15, %v238_v55, 0.0  ;;  %v305_v11 = vperm.slane %v897_v39, 1  ;;  %v308_v12 = vperm.slane %v887_v26, 1  ;;  %v360_v55 = vld [vmem:[%s1003_s21 + $0x38] sm:$0xff] }
  0x3c   : > { %v281_v13 = vsel %vm278_vm2, %v279_v53, 0.0  ;;  %vm294_vm10 = vcmp.eq.s32.totalorder %v292_v6, %v885_v9  ;;  %vm256_vm4 = vmand %vm251_vm0, %vm904_vm11  ;;  %vm969_vm5 = vcmp.eq.s32.totalorder %v292_v6, %v882_v5  ;;  %v312_v15 = vperm.slane %v913_v50, 1 }
  0x3d   : > { %v283_v16 = vadd.f32 %v281_v13, %v262_v63  ;;  %vm299_vm6 = vmand %vm294_vm10, %vm959_vm3  ;;  %v259_v17 = vsel %vm256_vm4, %v258_v47, 0.0  ;;  %vm980_vm7 = vcmp.eq.s32.totalorder %v305_v11, %v882_v5  ;;  %vm984_vm11 = vcmp.eq.s32.totalorder %v308_v12, 1 }
  0x3e   : > { %v302_v20 = vsel %vm299_vm6, %v300_v58, 0.0  ;;  %v261_v21 = vadd.f32 %v259_v17, %v239_v10  ;;  %vm277_vm8 = vmand %vm953_vm1, %vm939_vm12  ;;  %v317_v22 = vperm.slane %v892_v33, 1  ;;  %v320_v23 = vperm.slane %v889_v27, 1 }
  0x3f   : > { %v304_v24 = vadd.f32 %v302_v20, %v283_v16  ;;  %v280_v25 = vsel %vm277_vm8, %v279_v53, 0.0  ;;  %vm298_vm9 = vmand %vm969_vm5, %vm959_vm3  ;;  %v324_v26 = vperm.slane %v895_v36, 1  ;;  %v329_v28 = vperm.slane %v933_v60, 1  ;;  %v356_v53 = vld [vmem:[%s1003_s21 + $0x18] sm:$0xff] }
  0x40   : > { %v282_v29 = vadd.f32 %v280_v25, %v261_v21  ;;  %v301_v30 = vsel %vm298_vm9, %v300_v58, 0.0  ;;  %vm310_vm12 = vmand %vm980_vm7, %vm984_vm11  ;;  %vm318_vm13 = vcmp.eq.s32.totalorder %v317_v22, %v882_v5  ;;  %vm1010_vm14 = vcmp.eq.s32.totalorder %v320_v23, 1 }
  0x41   : > { %400 = vmatpush.msra.mxu0 %v304_v24  ;;  %609 = vmatpush.msra.mxu1 %v304_v24  ;;  %v313_v31 = vsel %vm310_vm12, %v312_v15, 0.0  ;;  %vm322_vm15 = vmand %vm318_vm13, %vm1010_vm14  ;;  %vm1019_vm0 = vcmp.eq.s32.totalorder %v329_v28, %v882_v5  ;;  %v332_v33 = vperm.slane %v930_v57, 1  ;;  %v336_v34 = vperm.slane %v908_v44, 1  ;;  %v357_v44 = vld [vmem:[%s1003_s21 + $0x20] sm:$0xff]  ;;  %s709_s21 = scalar_lea.hbm %s1125_s2, 16 }
  0x42   : > { %610 = vmatpush.msra.mxu2 %v304_v24  ;;  %611 = vmatpush.msra.mxu3 %v304_v24  ;;  %v303_v35 = vadd.f32 %v301_v30, %v282_v29  ;;  %v325_v36 = vsel %vm322_vm15, %v324_v26, 0.0  ;;  %v341_v37 = vperm.slane %v943_v3, 1  ;;  %v344_v38 = vperm.slane %v937_v1, 1  ;;  %p711_p5 = scmp.lt.s32.totalorder %s709_s21, %s705_s8 }
  0x43   : > { %vm361_vm1 = vcmask 130048   ;;  %v327_v42 = vadd.f32 %v325_v36, %v313_v31  ;;  %vm1029_vm2 = vcmp.eq.s32.totalorder %v332_v33, 1  ;;  %v348_v45 = vperm.slane %v915_v51, 1 }
  0x44   : > { %401 = vmatpush.msra.mxu0 %v303_v35  ;;  %612 = vmatpush.msra.mxu1 %v303_v35  ;;  %vm334_vm3 = vmand %vm1019_vm0, %vm1029_vm2  ;;  %vm342_vm10 = vcmp.eq.s32.totalorder %v341_v37, %v882_v5  ;;  %vm1041_vm4 = vcmp.eq.s32.totalorder %v344_v38, 1  ;;  %vm307_vm6 = vcmp.eq.s32.totalorder %v305_v11, %v885_v9  ;;  %vm319_vm7 = vcmp.eq.s32.totalorder %v317_v22, %v885_v9  ;;  %p712_p6 = por %p711_p5, %p710_p4 }
  0x45   : > { %613 = vmatpush.msra.mxu2 %v303_v35  ;;  %614 = vmatpush.msra.mxu3 %v303_v35  ;;  %v337_v48 = vsel %vm334_vm3, %v336_v34, 0.0  ;;  %vm346_vm5 = vmand %vm342_vm10, %vm1041_vm4  ;;  %vm331_vm12 = vcmp.eq.s32.totalorder %v329_v28, %v885_v9  ;;  %vm343_vm15 = vcmp.eq.s32.totalorder %v341_v37, %v885_v9 }
  0x46   : > { %595 = vmatmul.msk.f32.vlgmr.msra.gmra.mxu0 %vm361_vm1, %v353_v40  ;;  %597 = vmatmul.msk.f32.vlgmr.msra.gmra.mxu1 %vm361_vm1, %v355_v41  ;;  %v339_v49 = vadd.f32 %v337_v48, %v327_v42  ;;  %v349_v51 = vsel %vm346_vm5, %v348_v45, 0.0  ;;  %vm311_vm8 = vmand %vm307_vm6, %vm984_vm11  ;;  %vm463_vm11 = vcmask 1040384   ;;  %p713_p7 = pnand %p712_p6, %p708_p2 }
  0x47   : > { %599 = vmatmul.msk.f32.vlgmr.msra.gmra.mxu2 %vm361_vm1, %v357_v44  ;;  %601 = vmatmul.msk.f32.vlgmr.msra.gmra.mxu3 %vm361_vm1, %v359_v46  ;;  %v314_v56 = vsel %vm311_vm8, %v312_v15, 0.0  ;;  %vm323_vm9 = vmand %vm319_vm7, %vm1010_vm14  ;;  %vm465_vm14 = vcmask 1041408  }
  0x48   : > { %v351_v5 = vadd.f32 %v349_v51, %v339_v49  ;;  %v326_v57 = vsel %vm323_vm9, %v324_v26, 0.0  ;;  %vm335_vm13 = vmand %vm331_vm12, %vm1029_vm2 }
  0x49   : > { %v328_v58 = vadd.f32 %v326_v57, %v314_v56  ;;  %v338_v39 = vsel %vm335_vm13, %v336_v34, 0.0  ;;  %vm347_vm0 = vmand %vm343_vm15, %vm1041_vm4 }
  0x4a   : > { %v350_v60 = vsel %vm347_vm0, %v348_v45, 0.0 }
  0x4b   : > { %v340_v59 = vadd.f32 %v338_v39, %v328_v58 }
  0x4d   : > { %v352_v50 = vadd.f32 %v350_v60, %v340_v59 }
  0x4e   : > { %596 = vmatmul.msk.f32.gmra.mxu0 %vm361_vm1, %v354_v52  ;;  %598 = vmatmul.msk.f32.gmra.mxu1 %vm361_vm1, %v356_v53 }
  0x4f   : > { %600 = vmatmul.msk.f32.gmra.mxu2 %vm361_vm1, %v358_v54  ;;  %602 = vmatmul.msk.f32.gmra.mxu3 %vm361_vm1, %v360_v55  ;;  %vm467_vm1 = vcmask 1042432  }
  0xc3   : > { %v403_v61 = vpop.f32.mrf.mxu0  ;;  %v409_v62 = vpop.f32.mrf.mxu1 }
  0xc4   : > { %v427_v3 = vmul.f32 %v403_v61, %v351_v5  ;;  %v436_v4 = vmul.f32 %v409_v62, %v351_v5 }
  0xca   : > { %v415_v63 = vpop.f32.mrf.mxu2  ;;  %v421_v0 = vpop.f32.mrf.mxu3 }
  0xcb   : > { %v406_v1 = vpop.f32.mrf.mxu0  ;;  %v412_v2 = vpop.f32.mrf.mxu1  ;;  %v445_v16 = vmul.f32 %v415_v63, %v351_v5  ;;  %v454_v17 = vmul.f32 %v421_v0, %v351_v5 }
  0xcc   : > { %v428_v6 = vmul.f32 %v406_v1, %v352_v50  ;;  %v437_v7 = vmul.f32 %v412_v2, %v352_v50 }
  0xce   : > { %v429_v8 = vadd.f32 %v428_v6, %v427_v3  ;;  %v438_v10 = vadd.f32 %v437_v7, %v436_v4 }
  0xd0   : > { %v430_v9 = vrot.slane %v429_v8, 4  ;;  %v439_v11 = vrot.slane %v438_v10, 4 }
  0xd2   : > { %v431_v12 = vadd.f32 %v430_v9, %v429_v8  ;;  %v440_v13 = vadd.f32 %v439_v11, %v438_v10  ;;  %v418_v14 = vpop.f32.mrf.mxu2  ;;  %v424_v15 = vpop.f32.mrf.mxu3 }
  0xd3   : > { %v446_v18 = vmul.f32 %v418_v14, %v352_v50  ;;  %v455_v19 = vmul.f32 %v424_v15, %v352_v50 }
  0xd4   : > { %v432_v20 = vrot.slane %v431_v12, 2  ;;  %v441_v21 = vrot.slane %v440_v13, 2 }
  0xd5   : > { %v447_v22 = vadd.f32 %v446_v18, %v445_v16  ;;  %v456_v23 = vadd.f32 %v455_v19, %v454_v17 }
  0xd6   : > { %v433_v24 = vadd.f32 %v432_v20, %v431_v12  ;;  %v442_v25 = vadd.f32 %v441_v21, %v440_v13 }
  0xd7   : > { %v448_v26 = vrot.slane %v447_v22, 4  ;;  %v457_v28 = vrot.slane %v456_v23, 4 }
  0xd8   : > { %v434_v29 = vrot.slane %v433_v24, 1  ;;  %v443_v30 = vrot.slane %v442_v25, 1 }
  0xd9   : > { %v449_v27 = vadd.f32 %v448_v26, %v447_v22  ;;  %v458_v31 = vadd.f32 %v457_v28, %v456_v23 }
  0xda   : > { %v435_v32 = vadd.f32 %v434_v29, %v433_v24  ;;  %v444_v33 = vadd.f32 %v443_v30, %v442_v25 }
  0xdb   : > { %v450_v34 = vrot.slane %v449_v27, 2  ;;  %v459_v35 = vrot.slane %v458_v31, 2 }
  0xdc   : > { %v464_v36 = vsel %vm463_vm11, %v435_v32, %v444_v33 }
  0xdd   : > { %v451_v37 = vadd.f32 %v450_v34, %v449_v27  ;;  %v460_v38 = vadd.f32 %v459_v35, %v458_v31 }
  0xdf   : > { %v452_v40 = vrot.slane %v451_v37, 1  ;;  %v461_v41 = vrot.slane %v460_v38, 1 }
  0xe1   : > { %v453_v42 = vadd.f32 %v452_v40, %v451_v37  ;;  %v462_v43 = vadd.f32 %v461_v41, %v460_v38 }
  0xe3   : > { %v466_v45 = vsel %vm465_vm14, %v464_v36, %v453_v42 }
  0xe4   : > { %v468_v44 = vsel %vm467_vm1, %v466_v45, %v462_v43 }
  0xe5   : > { %469 = vst [vmem:[%s173_s3] sm:$0xf] %v468_v44 }
  0xe6   : > { %716 = shalt.err (!%p713_p7)
}
  0xe7   : > { %617 = dma.vmem_to_hbm [thread:$0]  (%p852_p3), %s486_s4, 64, %s488_s5, %s471_s6  }
  0xe8 PF: > { %p623_p9 = scmp.ge.s32.totalorder %s783_s16, 2  ;;  %s499_s25 = sand.u32 1, %s755_s9  }
  0xe9   : > { %s500_s28 = scalar_lea.sflag [#allocation3], %s499_s25 }
  0xea   : > { %p620_p10 = pnand %p623_p9, %p861_p8 }
  0xec   : > { %p621_p11 = pneg %p620_p10 }
  0xee   : > { %750 = dma.done.wait (%p621_p11), %s500_s28, 64  }
  0xef   : > { %752 = vsyncadd (%p621_p11), %s500_s28, 4294967232  ;;  %s15_s16 = sadd.s32 1, %s783_s16   ;;  %s1154_s9 = smov %s759_s10 }
  0xf0   : > { %p12_p12 = scmp.ge.s32.totalorder %s15_s16, 6   ;;  %s1155_s10 = smov %s763_s11 }
  0xf1   : > { %s1156_s11 = smov %s870_s27  ;;  %s1157_s12 = smov %s775_s14 }
  0xf2   : > { %s1158_s13 = smov %s779_s15  ;;  %s1159_s14 = smov %s1162_s19 }
  0xf3   : > { %s1160_s15 = smov %s1166_s20  ;;  %14 = sbr.rel (!%p12_p12) target bundleno = 5 (0x5), region = 66 }
  0xf8   :  { %506 = vsyncpa [#allocation3], 1 }
  0xf9   :  { %508 = vsyncpa [#allocation3 + $0x1], 1 }

</bundles_post_ra>
